<compile_context>
chip_gen: v7x
topology: tpu7x:2x2x1
jax: 0.10.0
libtpu: 0.0.40
codegen_flags: <defaults>
</compile_context>

<pallas_src>
import functools

import jax
import jax.numpy as jnp
from jax.experimental import pallas as pl
from jax.experimental.pallas import tpu as pltpu

_MIB = 1024 * 1024


def _sublane_multiple(dtype) -> int:
    """Native sublane packing for a dtype (8 for 4B, 16 for 2B, 32 for 1B)."""
    return max(8, 32 // jnp.dtype(dtype).itemsize)


def _padded_tile_bytes(shape, dtype) -> int:
    """Bytes one VMEM tile really occupies after sublane/lane padding."""
    *lead, rows, lanes = shape
    sub = _sublane_multiple(dtype)
    rows_p = -(-rows // sub) * sub
    lanes_p = -(-lanes // 128) * 128
    n = 1
    for d in lead:
        n *= int(d)
    return n * rows_p * lanes_p * jnp.dtype(dtype).itemsize


def _vmem_capacity_bytes() -> int:
    try:
        return int(pltpu.get_tpu_info().vmem_capacity_bytes)
    except Exception:
        return 64 * _MIB  # conservative default (v7x has 64 MiB per TensorCore)


def _step_vmem_bytes(c_tile, h_out, w_out, s, width, dtype) -> int:
    """Padded VMEM bytes per grid step: input + output tile, each double-buffered."""
    in_b = _padded_tile_bytes((1, c_tile * h_out, s * width), dtype)
    out_b = _padded_tile_bytes((1, s * s, c_tile * h_out, w_out), dtype)
    return 2 * (in_b + out_b)


def _select_c_tile(batch, num_ch, h_out, w_out, s, width, dtype, budget, min_steps=8):
    """Largest legal channel tile that fits the padded VMEM budget and keeps enough
    grid steps for megacore sharding / pipeline overlap."""
    sub = _sublane_multiple(dtype)

    def legal(ct):
        # (8,128) rule on the second-minor block dim of the input and output blocks.
        return (ct * h_out) % 8 == 0 or ct == num_ch

    divisors = [d for d in range(1, num_ch + 1) if num_ch % d == 0 and legal(d)]
    if not divisors:
        divisors = [num_ch]
    fitting = [d for d in divisors
               if _step_vmem_bytes(d, h_out, w_out, s, width, dtype) <= budget]
    if not fitting:
        # TODO(synk): also split along h_out when even a single-channel tile
        # exceeds the VMEM budget (huge per-channel images).
        fitting = [min(divisors)]

    def steps(d):
        return batch * (num_ch // d)

    target = min(min_steps, max(steps(d) for d in fitting))
    enough = [d for d in fitting if steps(d) >= target]
    aligned = [d for d in enough if (d * h_out) % sub == 0]
    return max(aligned) if aligned else max(enough)


def _reorg_kernel(x_ref, sel_ref, o_ref, *, stride, width, precision):
    # x_ref block:   (1, c_tile*_H, s*W)   rows = (c, i), lanes = sh*W + j*s + sw
    # sel_ref block: (s, W, _W)            resident one-hot gather matrices
    # o_ref block:   (1, s*s, c_tile*_H, _W)
    s = stride
    for sh in range(s):                                  # static unroll; s is tiny
        # Contiguous lane slice for this sh phase (plain vector load, no stride).
        tile = x_ref[0, :, pl.ds(sh * width, width)]     # (c_tile*_H, W)
        for sw in range(s):
            gathered = jnp.dot(                          # exact one-hot gather on MXU
                tile, sel_ref[sw],
                preferred_element_type=jnp.float32,
                precision=precision,
            )                                            # (c_tile*_H, _W)
            o_ref[0, sh * s + sw] = gathered.astype(o_ref.dtype)


@functools.partial(jax.jit, static_argnames=("stride", "c_tile"))
def reorg_layer_forward(x, *, stride, c_tile=None):
    """Pallas TPU implementation of reorg_layer(stride).forward(x), x in NCHW."""
    if x.ndim != 4:
        raise ValueError(f"expected NCHW input, got shape {x.shape}")
    batch, num_ch, height, width = x.shape
    s = int(stride)
    if s == 1:
        return x
    if height % s or width % s:
        raise ValueError(f"spatial dims {height}x{width} not divisible by stride {s}")

    if x.dtype == jnp.bfloat16:
        sel_dtype, precision = jnp.bfloat16, None                      # 1 MXU pass, exact
    elif x.dtype == jnp.float32:
        sel_dtype, precision = jnp.float32, jax.lax.Precision.HIGHEST  # exact f32 split
    else:
        # TODO(synk): integer / fp16 inputs need a non-MXU gather path (strided loads
        # or VPU selects); the one-hot MXU trick is only exact for f32/bf16.
        raise NotImplementedError(f"reorg kernel supports f32/bf16, got {x.dtype}")

    h_out, w_out = height // s, width // s
    itemsize = jnp.dtype(x.dtype).itemsize

    vmem_cap = _vmem_capacity_bytes()
    budget = min(vmem_cap // 2, 40 * _MIB)
    if c_tile is None:
        c_tile = _select_c_tile(batch, num_ch, h_out, w_out, s, width, x.dtype, budget)
    if num_ch % c_tile:
        raise ValueError(f"c_tile={c_tile} must divide channels={num_ch}")

    # Free reshape: x[b, c, i*s+sh, j*s+sw] -> xr[b, c*_H + i, sh*W + j*s + sw]
    xr = x.reshape(batch, num_ch * h_out, s * width)

    # One-hot gather matrices, one per sw phase: sel[sw, l, j] = (l == j*s + sw).
    lanes = jnp.arange(width, dtype=jnp.int32)
    cols = jnp.arange(w_out, dtype=jnp.int32) * s
    phases = jnp.arange(s, dtype=jnp.int32)
    sel = (lanes[None, :, None] == (cols[None, None, :] + phases[:, None, None]))
    sel = sel.astype(sel_dtype)                                        # (s, W, _W)

    # vmem_limit: padded double-buffered working set + resident sel + headroom.
    step_bytes = _step_vmem_bytes(c_tile, h_out, w_out, s, width, x.dtype)
    sel_bytes = 2 * _padded_tile_bytes((s, width, w_out), sel_dtype)
    vmem_limit = min(int(vmem_cap * 0.9),
                     max(step_bytes + sel_bytes + 4 * _MIB, 32 * _MIB))

    kernel = functools.partial(_reorg_kernel, stride=s, width=width, precision=precision)
    grid = (batch, num_ch // c_tile)
    mxu_passes = 1 if x.dtype == jnp.bfloat16 else 6

    o4 = pl.pallas_call(
        kernel,
        out_shape=jax.ShapeDtypeStruct((batch, s * s, num_ch * h_out, w_out), x.dtype),
        grid=grid,
        in_specs=[
            pl.BlockSpec((1, c_tile * h_out, s * width), lambda b, ci: (b, ci, 0)),
            pl.BlockSpec((s, width, w_out), lambda b, ci: (0, 0, 0)),
        ],
        out_specs=pl.BlockSpec(
            (1, s * s, c_tile * h_out, w_out), lambda b, ci: (b, 0, ci, 0)
        ),
        compiler_params=pltpu.CompilerParams(
            dimension_semantics=("parallel", "parallel"),
            vmem_limit_bytes=vmem_limit,
        ),
        cost_estimate=pl.CostEstimate(
            flops=2 * mxu_passes * batch * num_ch * height * width * width,
            transcendentals=0,
            bytes_accessed=2 * x.size * itemsize + sel.size * jnp.dtype(sel_dtype).itemsize,
        ),
    )(xr, sel)

    # Free reshape: (B, s*s, C*_H, _W) -> (B, s*s*C, _H, _W); channel = (sh*s+sw)*C + c.
    return o4.reshape(batch, s * s * num_ch, h_out, w_out)


if __name__ == "__main__":
    B, C, H, W = 2, 4, 16, 16
    STRIDE = 2

    key = jax.random.PRNGKey(0)
    x = jax.random.normal(key, (B, C, H, W), dtype=jnp.float32)

    def reorg_ref(v, s):
        b, c, h, w = v.shape
        ho, wo = h // s, w // s
        r = v.reshape(b, c, ho, s, wo, s)
        return jnp.transpose(r, (0, 3, 5, 1, 2, 4)).reshape(b, s * s * c, ho, wo)

    # f32 path (HIGHEST-precision one-hot gather -> exact data movement)
    out = reorg_layer_forward(x, stride=STRIDE)
    jax.block_until_ready(out)
    ref = reorg_ref(x, STRIDE)
    assert out.shape == (B, STRIDE * STRIDE * C, H // STRIDE, W // STRIDE), out.shape
    assert bool(jnp.allclose(out, ref, rtol=1e-6, atol=1e-6)), "f32 reorg mismatch"

    # bf16 path (single DEFAULT-precision MXU pass -> exact data movement)
    xb = x.astype(jnp.bfloat16)
    out_b = reorg_layer_forward(xb, stride=STRIDE)
    jax.block_until_ready(out_b)
    assert bool(jnp.array_equal(out_b, reorg_ref(xb, STRIDE))), "bf16 reorg mismatch"

    print("KERNEL_OK")
</pallas_src>

<mosaic_0001>
module attributes {stable_mosaic.version = 11 : i64} {
  func.func @_reorg_kernel(%arg0: i32, %arg1: i32, %arg2: memref<1x8x32xf32, #tpu.memory_space<vmem>>, %arg3: memref<2x16x8xf32, #tpu.memory_space<vmem>>, %arg4: memref<1x4x8x8xf32, #tpu.memory_space<vmem>>) attributes {dimension_semantics = [#tpu.dimension_semantics<parallel>, #tpu.dimension_semantics<parallel>], iteration_bounds = array<i64: 2, 4>, scalar_prefetch = 0 : i64, scratch_operands = 0 : i64, tpu.core_type = #tpu.core_type<tc>, window_params = [{transform_indices = @transform_0, window_bounds = array<i64: 1, 8, 32>}, {pipeline_mode = #tpu.pipeline_mode<synchronous>, transform_indices = @transform_1, window_bounds = array<i64: 2, 16, 8>}, {transform_indices = @transform_2, window_bounds = array<i64: 1, 4, 8, 8>}]} {
    %c0 = arith.constant 0 : index
    %c0_0 = arith.constant 0 : index
    %c0_1 = arith.constant 0 : index
    %0 = vector.load %arg2[%c0, %c0_0, %c0_1] : memref<1x8x32xf32, #tpu.memory_space<vmem>>, vector<1x8x16xf32>
    %1 = vector.shape_cast %0 : vector<1x8x16xf32> to vector<8x16xf32>
    %c0_2 = arith.constant 0 : index
    %c0_3 = arith.constant 0 : index
    %c0_4 = arith.constant 0 : index
    %2 = vector.load %arg3[%c0_2, %c0_3, %c0_4] : memref<2x16x8xf32, #tpu.memory_space<vmem>>, vector<1x16x8xf32>
    %3 = vector.shape_cast %2 : vector<1x16x8xf32> to vector<16x8xf32>
    %cst = arith.constant dense<0.000000e+00> : vector<8x8xf32>
    %4 = tpu.matmul %1, %3, %cst {dimension_numbers = #tpu.dot_dimension_numbers<[1], [0], [0], [1], [0, 0, 1, 1], [], []>, precision = #tpu.contract_precision<fp32>} : vector<8x16xf32>, vector<16x8xf32>, vector<8x8xf32> -> vector<8x8xf32>
    %c0_5 = arith.constant 0 : index
    %c0_6 = arith.constant 0 : index
    %c0_7 = arith.constant 0 : index
    %c0_8 = arith.constant 0 : index
    %5 = vector.load %arg4[%c0_5, %c0_6, %c0_7, %c0_8] : memref<1x4x8x8xf32, #tpu.memory_space<vmem>>, vector<1x1x8x8xf32>
    %6 = vector.shape_cast %5 : vector<1x1x8x8xf32> to vector<8x8xf32>
    %7 = vector.shape_cast %4 : vector<8x8xf32> to vector<1x1x8x8xf32>
    tpu.vector_store %arg4[%c0_5, %c0_6, %c0_7, %c0_8], %7 {strides = array<i32>} : memref<1x4x8x8xf32, #tpu.memory_space<vmem>>, vector<1x1x8x8xf32>,
    %c1 = arith.constant 1 : index
    %c0_9 = arith.constant 0 : index
    %c0_10 = arith.constant 0 : index
    %8 = vector.load %arg3[%c1, %c0_9, %c0_10] : memref<2x16x8xf32, #tpu.memory_space<vmem>>, vector<1x16x8xf32>
    %9 = vector.shape_cast %8 : vector<1x16x8xf32> to vector<16x8xf32>
    %cst_11 = arith.constant dense<0.000000e+00> : vector<8x8xf32>
    %10 = tpu.matmul %1, %9, %cst_11 {dimension_numbers = #tpu.dot_dimension_numbers<[1], [0], [0], [1], [0, 0, 1, 1], [], []>, precision = #tpu.contract_precision<fp32>} : vector<8x16xf32>, vector<16x8xf32>, vector<8x8xf32> -> vector<8x8xf32>
    %c0_12 = arith.constant 0 : index
    %c1_13 = arith.constant 1 : index
    %c0_14 = arith.constant 0 : index
    %c0_15 = arith.constant 0 : index
    %11 = vector.load %arg4[%c0_12, %c1_13, %c0_14, %c0_15] : memref<1x4x8x8xf32, #tpu.memory_space<vmem>>, vector<1x1x8x8xf32>
    %12 = vector.shape_cast %11 : vector<1x1x8x8xf32> to vector<8x8xf32>
    %13 = vector.shape_cast %10 : vector<8x8xf32> to vector<1x1x8x8xf32>
    tpu.vector_store %arg4[%c0_12, %c1_13, %c0_14, %c0_15], %13 {strides = array<i32>} : memref<1x4x8x8xf32, #tpu.memory_space<vmem>>, vector<1x1x8x8xf32>,
    %c0_16 = arith.constant 0 : index
    %c0_17 = arith.constant 0 : index
    %c16 = arith.constant 16 : index
    %14 = vector.load %arg2[%c0_16, %c0_17, %c16] : memref<1x8x32xf32, #tpu.memory_space<vmem>>, vector<1x8x16xf32>
    %15 = vector.shape_cast %14 : vector<1x8x16xf32> to vector<8x16xf32>
    %c0_18 = arith.constant 0 : index
    %c0_19 = arith.constant 0 : index
    %c0_20 = arith.constant 0 : index
    %16 = vector.load %arg3[%c0_18, %c0_19, %c0_20] : memref<2x16x8xf32, #tpu.memory_space<vmem>>, vector<1x16x8xf32>
    %17 = vector.shape_cast %16 : vector<1x16x8xf32> to vector<16x8xf32>
    %cst_21 = arith.constant dense<0.000000e+00> : vector<8x8xf32>
    %18 = tpu.matmul %15, %17, %cst_21 {dimension_numbers = #tpu.dot_dimension_numbers<[1], [0], [0], [1], [0, 0, 1, 1], [], []>, precision = #tpu.contract_precision<fp32>} : vector<8x16xf32>, vector<16x8xf32>, vector<8x8xf32> -> vector<8x8xf32>
    %c0_22 = arith.constant 0 : index
    %c2 = arith.constant 2 : index
    %c0_23 = arith.constant 0 : index
    %c0_24 = arith.constant 0 : index
    %19 = vector.load %arg4[%c0_22, %c2, %c0_23, %c0_24] : memref<1x4x8x8xf32, #tpu.memory_space<vmem>>, vector<1x1x8x8xf32>
    %20 = vector.shape_cast %19 : vector<1x1x8x8xf32> to vector<8x8xf32>
    %21 = vector.shape_cast %18 : vector<8x8xf32> to vector<1x1x8x8xf32>
    tpu.vector_store %arg4[%c0_22, %c2, %c0_23, %c0_24], %21 {strides = array<i32>} : memref<1x4x8x8xf32, #tpu.memory_space<vmem>>, vector<1x1x8x8xf32>,
    %c1_25 = arith.constant 1 : index
    %c0_26 = arith.constant 0 : index
    %c0_27 = arith.constant 0 : index
    %22 = vector.load %arg3[%c1_25, %c0_26, %c0_27] : memref<2x16x8xf32, #tpu.memory_space<vmem>>, vector<1x16x8xf32>
    %23 = vector.shape_cast %22 : vector<1x16x8xf32> to vector<16x8xf32>
    %cst_28 = arith.constant dense<0.000000e+00> : vector<8x8xf32>
    %24 = tpu.matmul %15, %23, %cst_28 {dimension_numbers = #tpu.dot_dimension_numbers<[1], [0], [0], [1], [0, 0, 1, 1], [], []>, precision = #tpu.contract_precision<fp32>} : vector<8x16xf32>, vector<16x8xf32>, vector<8x8xf32> -> vector<8x8xf32>
    %c0_29 = arith.constant 0 : index
    %c3 = arith.constant 3 : index
    %c0_30 = arith.constant 0 : index
    %c0_31 = arith.constant 0 : index
    %25 = vector.load %arg4[%c0_29, %c3, %c0_30, %c0_31] : memref<1x4x8x8xf32, #tpu.memory_space<vmem>>, vector<1x1x8x8xf32>
    %26 = vector.shape_cast %25 : vector<1x1x8x8xf32> to vector<8x8xf32>
    %27 = vector.shape_cast %24 : vector<8x8xf32> to vector<1x1x8x8xf32>
    tpu.vector_store %arg4[%c0_29, %c3, %c0_30, %c0_31], %27 {strides = array<i32>} : memref<1x4x8x8xf32, #tpu.memory_space<vmem>>, vector<1x1x8x8xf32>,
    return
  }
  func.func @transform_0(%arg0: i32, %arg1: i32) -> (i32, i32, i32) {
    %c0_i32 = arith.constant 0 : i32
    %c0_i32_0 = arith.constant 0 : i32
    return %arg0, %arg1, %c0_i32 : i32, i32, i32
  }
  func.func @transform_1(%arg0: i32, %arg1: i32) -> (i32, i32, i32) {
    %c0_i32 = arith.constant 0 : i32
    %c0_i32_0 = arith.constant 0 : i32
    %c0_i32_1 = arith.constant 0 : i32
    %c0_i32_2 = arith.constant 0 : i32
    return %c0_i32, %c0_i32_0, %c0_i32_1 : i32, i32, i32
  }
  func.func @transform_2(%arg0: i32, %arg1: i32) -> (i32, i32, i32, i32) {
    %c0_i32 = arith.constant 0 : i32
    %c0_i32_0 = arith.constant 0 : i32
    %c0_i32_1 = arith.constant 0 : i32
    return %arg0, %c0_i32, %arg1, %c0_i32_0 : i32, i32, i32, i32
  }
}

</mosaic_0001>

<bundles_post_ra>
// kernel: reorg_layer_forward.1
= control target key start
LH: loop header
LB: loop body
LE: loop exit
PB: predicated region body
PF: predicated region fallthrough
CT: control target
= control target key end

     0   :  { %s2659_s9 = smov 0   ;;  %s2661_s10 = smov 0   ;;  %s2874_s0 = inlined_call_operand.vmem [shape: f32[2,32,32], index: 0, kind: input, shape index: {}]   ;;  %s2875_s1 = inlined_call_operand.vmem [shape: f32[2,16,8], index: 1, kind: input, shape index: {}]   ;;  %s2876_s2 = inlined_call_operand.vmem [shape: f32[2,4,32,8], index: 2, kind: output, shape index: {}]  }
   0x1   :  { %s2663_s11 = smov 0   ;;  %s2665_s12 = smov 0  }
   0x2   :  { %s2667_s13 = smov 0   ;;  %s2669_s14 = smov 0  }
   0x3   :  { %s2671_s15 = smov 0  }
   0x4 LB: > { %s21_s16 = sadd.s32 1, %s2630_s13  ;;  %s24_s17 = sadd.s32 1, %s2634_s14  ;;  %s2638_s15 = sphi %s2671_s15, %s12_s15   ;;  %s2634_s14 = sphi %s2669_s14, %s2883_s14   ;;  %s2630_s13 = sphi %s2667_s13, %s2882_s13   ;;  %s2626_s12 = sphi %s2665_s12, %s2881_s12   ;;  %s2622_s11 = sphi %s2663_s11, %s2880_s11   ;;  %s2618_s10 = sphi %s2661_s10, %s2879_s10   ;;  %s2614_s9 = sphi %s2659_s9, %s2878_s9  }
   0x5   : > { %p22_p0 = scmp.ge.s32.totalorder %s21_s16, 4  ;;  %s2152_s18 = sadd.s32 4294967295, %s2638_s15  }
   0x6   : > { %p92_p1 = scmp.ne.s32.totalorder %s2618_s10, %s2614_s9  ;;  %p93_p2 = scmp.eq.s32.totalorder %s2152_s18, 7 }
   0x7   : > { %s2885_s16 = smov (%p22_p0, %s21_s16), 0  ;;  %s2887_s17 = smov (!%p22_p0, %s24_s17), %s2634_s14 }
   0x8   : > { %s78_s19 = ssub.s32 %s2630_s13, %s2885_s16  ;;  %p26_p3 = scmp.ge.s32.totalorder %s2887_s17, 2 }
   0x9   : > { %p2156_p4 = scmp.ge.s32.totalorder %s2638_s15, 1  ;;  %p2705_p5 = por %p93_p2, %p92_p1 }
   0xa   : > { %p131_p6 = scmp.lt.s32.totalorder %s2638_s15, 9  ;;  %s2889_s17 = smov (%p26_p3, %s2887_s17), 0 }
   0xb   : > { %s77_s21 = ssub.s32 %s2634_s14, %s2889_s17  ;;  %s82_s23 = sadd.s32 1, %s2618_s10 }
   0xc   : > { %p132_p7 = pnand %p2156_p4, %p131_p6  ;;  %s79_s22 = sor.u32 %s78_s19, %s77_s21 }
   0xd   : > { %p80_p8 = scmp.eq.s32.totalorder %s79_s22, 0  ;;  %p155_p9 = scmp.lt.s32.totalorder (!%p132_p7), %s2626_s12, 1  ;;  %v164_v0 = vld [vmem:[%s2875_s1] sm:$0xff] (!%p132_p7)  ;;  %v165_v1 = vld [vmem:[%s2875_s1 + $0x8] sm:$0xff] (!%p132_p7)  ;;  %v2640_v2 = vmov (!%p132_p7), 0.0|0.0   ;;  %v2160_v5 = vld [vmem:[%s2875_s1 + $0x10] sm:$0xff] (!%p132_p7) }
   0xe   : > { %135 = sbr.rel (%p132_p7) target bundleno = 415 (0x19f), region = 28  ;;  %p157_p10 = scmp.lt.s32.totalorder (!%p132_p7), %s2622_s11, 3  ;;  %2412 = vmatprep.subr.bf16.mxu0 (!%p132_p7), %v2640_v2  ;;  %2430 = vmatprep.subr.bf16.mxu1 (!%p132_p7), %v2640_v2  ;;  %v171_v3 = vand.u32 (!%p132_p7), 4294901760, %v164_v0  ;;  %v174_v4 = vand.u32 (!%p132_p7), 4294901760, %v165_v1  ;;  %v2161_v6 = vld [vmem:[%s2875_s1 + $0x18] sm:$0xff] (!%p132_p7)  ;;  %v635_v7 = vand.u32 (!%p132_p7), 4294901760, %v2160_v5 }
   0xf   : > { %s2716_s24 = scalar_select %p80_p8, %s2618_s10, %s82_s23  }
  0x10   : > { %v638_v8 = vand.u32 (!%p132_p7), 4294901760, %v2161_v6  ;;  %v2736_v9 = vpack.c.bf16 (!%p132_p7), %v174_v4, %v171_v3  ;;  %v2738_v10 = vsub.f32 (!%p132_p7), %v164_v0, %v171_v3  ;;  %v2740_v11 = vsub.f32 (!%p132_p7), %v165_v1, %v174_v4  ;;  %s2643_s23 = smov (!%p132_p7), 112   ;;  %s152_s25 = sand.u32 (!%p132_p7), 1, %s2614_s9  }
  0x11   : > { %vm2641_vm0 = vmmov (!%p132_p7), 0   ;;  %v2642_v12 = vmov (!%p132_p7), 0.0   ;;  %v713_v14 = vsub.f32 (!%p132_p7), %v2160_v5, %v635_v7  ;;  %vm166_vm1 = vcmask (!%p132_p7), 130048   ;;  %s2157_s26 = sshll.u32 (!%p132_p7), %s152_s25, 5 }
  0x12   : > { %2248 = vmatprep.mubr.msk.f32.mxu0 (!%p132_p7), %vm2641_vm0, %v2642_v12  ;;  %2290 = vmatprep.mubr.msk.f32.mxu1 (!%p132_p7), %vm2641_vm0, %v2642_v12  ;;  %v2746_v13 = vpack.c.bf16 (!%p132_p7), %v638_v8, %v635_v7  ;;  %v720_v15 = vsub.f32 (!%p132_p7), %v2161_v6, %v638_v8  ;;  %v250_v16 = vand.u32 (!%p132_p7), 4294901760, %v2738_v10  ;;  %v257_v17 = vand.u32 (!%p132_p7), 4294901760, %v2740_v11  ;;  %s154_s27 = scalar_lea.vmem (!%p132_p7), [#allocation2], %s2157_s26 }
  0x13   : > { %2414 = vmatpush3.bf16.msra.mxu0 (!%p132_p7), %v2736_v9  ;;  %v714_v18 = vand.u32 (!%p132_p7), 4294901760, %v713_v14  ;;  %v2419_v37 = vpack.c.bf16 (!%p132_p7), %v2740_v11, %v2738_v10  ;;  %vm629_vm2 = vcmask (!%p132_p7), 64512  }
  0x14   : > { %2432 = vmatpush3.bf16.msra.mxu1 (!%p132_p7), %v2746_v13  ;;  %2415 = vmatprep.subr.bf16.mxu0 (!%p132_p7), %v2640_v2  ;;  %v721_v19 = vand.u32 (!%p132_p7), 4294901760, %v720_v15  ;;  %v251_v21 = vsub.f32 (!%p132_p7), %v2738_v10, %v250_v16  ;;  %v258_v23 = vsub.f32 (!%p132_p7), %v2740_v11, %v257_v17  ;;  %v2437_v38 = vpack.c.bf16 (!%p132_p7), %v720_v15, %v713_v14 }
  0x15   : > { %s156_s5 = scalar_select %p155_p9, %s2626_s12, 1  ;;  %2433 = vmatprep.subr.bf16.mxu1 %v2640_v2  ;;  %v715_v24 = vsub.f32 %v713_v14, %v714_v18  ;;  %v2425_v39 = vpack.c.bf16 %v257_v17, %v250_v16 }
  0x16   : > { %s158_s6 = scalar_select %p157_p10, %s2622_s11, 3  ;;  %v722_v25 = vsub.f32 %v720_v15, %v721_v19  ;;  %v252_v28 = vand.u32 4294901760, %v251_v21  ;;  %v259_v29 = vand.u32 4294901760, %v258_v23  ;;  %v2443_v40 = vpack.c.bf16 %v721_v19, %v714_v18 }
  0x17   : > { %s2158_s7 = sshll.u32 %s156_s5, 2  ;;  %v716_v30 = vand.u32 4294901760, %v715_v24  ;;  %s2168_s9 = sshll.u32 (%p2705_p5), %s2626_s12, 4 }
  0x18   : > { %s160_s8 = sadd.s32 %s2158_s7, %s158_s6  ;;  %v723_v31 = vand.u32 4294901760, %v722_v25  ;;  %v2760_v34 = vpack.c.bf16 %v259_v29, %v252_v28  ;;  %s2035_s28 = sadd.s32 (%p2705_p5), %s2622_s11, %s2168_s9 }
  0x19   : > { %s2159_s18 = sshll.u32 %s160_s8, 3  ;;  %s2169_s29 = sshll.u32 (%p2705_p5), %s2035_s28, 3 }
  0x1a   : > { %s162_s22 = scalar_lea.vmem %s2874_s0, %s2159_s18  ;;  %v2762_v35 = vpack.c.bf16 %v723_v31, %v716_v30  ;;  %s2037_s4 = scalar_lea.vmem (%p2705_p5), %s2876_s2, %s2169_s29 }
  0x1b   : > { %v163_v20 = vld [vmem:[%s162_s22] sm:$0xff] }
  0x1c   : > { %v168_v22 = vsel %vm166_vm1, %v163_v20, 0  ;;  %1099 = vrot.lane.b32.xlu0 %v163_v20, %s2643_s23 }
  0x1d   : > { %v237_v26 = vand.u32 4294901760, %v168_v22 }
  0x1f   : > { %v238_v27 = vsub.f32 %v168_v22, %v237_v26 }
  0x21   : > { %v239_v32 = vand.u32 4294901760, %v238_v27 }
  0x23   : > { %v240_v33 = vsub.f32 %v238_v27, %v239_v32 }
  0x25   : > { %v241_v36 = vand.u32 4294901760, %v240_v33 }
  0x27   : > { %2249 = vmatmul.mubr.f32.vlgmr.msra.gmra.mrb[0].mxu0 %v241_v36  ;;  %2291 = vmatmul.mubr.f32.vlgmr.msra.gmra.mrb[0].mxu1 %v241_v36 }
  0x28   : > { %2417 = vmatpush3.bf16.msra.mxu0 %v2760_v34  ;;  %2435 = vmatpush3.bf16.msra.mxu1 %v2762_v35 }
  0x29   : > { %2255 = vmatprep.mubr.msk.f32.mxu0 %vm2641_vm0, %v2642_v12  ;;  %2297 = vmatprep.mubr.msk.f32.mxu1 %vm2641_vm0, %v2642_v12 }
  0x2a   : > { %2418 = vmatprep.subr.bf16.mxu0 %v2640_v2  ;;  %2436 = vmatprep.subr.bf16.mxu1 %v2640_v2 }
  0x2f   : > { %2256 = vmatmul.mubr.f32.vlgmr.msra.gmra.mrb[0].mxu0 %v237_v26  ;;  %2298 = vmatmul.mubr.f32.vlgmr.msra.gmra.mrb[0].mxu1 %v237_v26 }
  0x30   : > { %2420 = vmatpush3.bf16.msra.mxu0 %v2419_v37  ;;  %2438 = vmatpush3.bf16.msra.mxu1 %v2437_v38 }
  0x31   : > { %2262 = vmatprep.mubr.msk.f32.mxu0 %vm2641_vm0, %v2642_v12  ;;  %2304 = vmatprep.mubr.msk.f32.mxu1 %vm2641_vm0, %v2642_v12 }
  0x32   : > { %2421 = vmatprep.subr.bf16.mxu0 %v2640_v2  ;;  %2439 = vmatprep.subr.bf16.mxu1 %v2640_v2 }
  0x37   : > { %2263 = vmatmul.mubr.f32.vlgmr.msra.gmra.mrb[0].mxu0 %v238_v27  ;;  %2305 = vmatmul.mubr.f32.vlgmr.msra.gmra.mrb[0].mxu1 %v238_v27 }
  0x38   : > { %2423 = vmatpush3.bf16.msra.mxu0 %v2736_v9  ;;  %2441 = vmatpush3.bf16.msra.mxu1 %v2746_v13 }
  0x39   : > { %2269 = vmatprep.mubr.msk.f32.mxu0 %vm2641_vm0, %v2642_v12  ;;  %2311 = vmatprep.mubr.msk.f32.mxu1 %vm2641_vm0, %v2642_v12 }
  0x3a   : > { %2424 = vmatprep.subr.bf16.mxu0 %v2640_v2  ;;  %2442 = vmatprep.subr.bf16.mxu1 %v2640_v2 }
  0x3f   : > { %2270 = vmatmul.mubr.f32.vlgmr.msra.gmra.mrb[0].mxu0 %v239_v32  ;;  %2312 = vmatmul.mubr.f32.vlgmr.msra.gmra.mrb[0].mxu1 %v239_v32 }
  0x40   : > { %2426 = vmatpush3.bf16.msra.mxu0 %v2425_v39  ;;  %2444 = vmatpush3.bf16.msra.mxu1 %v2443_v40 }
  0x41   : > { %2276 = vmatprep.mubr.msk.f32.mxu0 %vm2641_vm0, %v2642_v12  ;;  %2318 = vmatprep.mubr.msk.f32.mxu1 %vm2641_vm0, %v2642_v12 }
  0x42   : > { %2427 = vmatprep.subr.bf16.mxu0 %v2640_v2  ;;  %2445 = vmatprep.subr.bf16.mxu1 %v2640_v2 }
  0x47   : > { %2277 = vmatmul.mubr.f32.vlgmr.msra.gmra.mrb[0].mxu0 %v237_v26  ;;  %2319 = vmatmul.mubr.f32.vlgmr.msra.gmra.mrb[0].mxu1 %v237_v26 }
  0x48   : > { %2429 = vmatpush3.bf16.msra.mxu0 %v2736_v9  ;;  %2447 = vmatpush3.bf16.msra.mxu1 %v2746_v13 }
  0x49   : > { %2283 = vmatprep.mubr.msk.f32.mxu0 %vm2641_vm0, %v2642_v12  ;;  %2325 = vmatprep.mubr.msk.f32.mxu1 %vm2641_vm0, %v2642_v12 }
  0x4a   : > { %2448 = vmatprep.subr.bf16.mxu0 %v2640_v2  ;;  %2466 = vmatprep.subr.bf16.mxu1 %v2640_v2 }
  0x4f   : > { %2284 = vmatmul.mubr.f32.vlgmr.msra.gmra.mrb[0].mxu0 %v237_v26  ;;  %2326 = vmatmul.mubr.f32.vlgmr.msra.gmra.mrb[0].mxu1 %v237_v26 }
  0x50   : > { %2450 = vmatpush3.bf16.msra.mxu0 %v2736_v9  ;;  %2468 = vmatpush3.bf16.msra.mxu1 %v2746_v13 }
  0x51   : > { %2332 = vmatprep.mubr.msk.f32.mxu0 %vm2641_vm0, %v2642_v12  ;;  %2451 = vmatprep.subr.bf16.mxu0 %v2640_v2 }
  0x52   : > { %2374 = vmatprep.mubr.msk.f32.mxu1 %vm2641_vm0, %v2642_v12  ;;  %2469 = vmatprep.subr.bf16.mxu1 %v2640_v2 }
  0x8e   : > { %v1100_v41 = vpop.permute.xlu0 %1099 }
  0x8f   : > { %v1101_v42 = vsel %vm166_vm1, %v1100_v41, 0 }
  0x90   : > { %v1170_v43 = vand.u32 4294901760, %v1101_v42 }
  0x92   : > { %v1171_v44 = vsub.f32 %v1101_v42, %v1170_v43 }
  0x94   : > { %v1172_v45 = vand.u32 4294901760, %v1171_v44 }
  0x96   : > { %v1173_v46 = vsub.f32 %v1171_v44, %v1172_v45 }
  0x98   : > { %v1174_v47 = vand.u32 4294901760, %v1173_v46 }
  0x9a   : > { %2333 = vmatmul.mubr.f32.vlgmr.msra.gmra.mrb[2].mxu0 %v1174_v47  ;;  %2375 = vmatmul.mubr.f32.vlgmr.msra.gmra.mrb[2].mxu1 %v1174_v47 }
  0x9b   : > { %2453 = vmatpush3.bf16.msra.mxu0 %v2760_v34  ;;  %2471 = vmatpush3.bf16.msra.mxu1 %v2762_v35 }
  0x9c   : > { %2339 = vmatprep.mubr.msk.f32.mxu0 %vm2641_vm0, %v2642_v12  ;;  %2454 = vmatprep.subr.bf16.mxu0 %v2640_v2 }
  0x9d   : > { %2381 = vmatprep.mubr.msk.f32.mxu1 %vm2641_vm0, %v2642_v12  ;;  %2472 = vmatprep.subr.bf16.mxu1 %v2640_v2 }
  0xa2   : > { %2340 = vmatmul.mubr.f32.vlgmr.msra.gmra.mrb[2].mxu0 %v1170_v43  ;;  %2382 = vmatmul.mubr.f32.vlgmr.msra.gmra.mrb[2].mxu1 %v1170_v43 }
  0xa3   : > { %2456 = vmatpush3.bf16.msra.mxu0 %v2419_v37  ;;  %2474 = vmatpush3.bf16.msra.mxu1 %v2437_v38 }
  0xa4   : > { %2346 = vmatprep.mubr.msk.f32.mxu0 %vm2641_vm0, %v2642_v12  ;;  %2457 = vmatprep.subr.bf16.mxu0 %v2640_v2 }
  0xa5   : > { %2388 = vmatprep.mubr.msk.f32.mxu1 %vm2641_vm0, %v2642_v12  ;;  %2475 = vmatprep.subr.bf16.mxu1 %v2640_v2 }
  0xaa   : > { %2347 = vmatmul.mubr.f32.vlgmr.msra.gmra.mrb[2].mxu0 %v1171_v44  ;;  %2389 = vmatmul.mubr.f32.vlgmr.msra.gmra.mrb[2].mxu1 %v1171_v44 }
  0xab   : > { %2459 = vmatpush3.bf16.msra.mxu0 %v2736_v9  ;;  %2477 = vmatpush3.bf16.msra.mxu1 %v2746_v13 }
  0xac   : > { %2353 = vmatprep.mubr.msk.f32.mxu0 %vm2641_vm0, %v2642_v12  ;;  %2460 = vmatprep.subr.bf16.mxu0 %v2640_v2 }
  0xad   : > { %2395 = vmatprep.mubr.msk.f32.mxu1 %vm2641_vm0, %v2642_v12  ;;  %2478 = vmatprep.subr.bf16.mxu1 %v2640_v2 }
  0xb2   : > { %2354 = vmatmul.mubr.f32.vlgmr.msra.gmra.mrb[2].mxu0 %v1172_v45  ;;  %2396 = vmatmul.mubr.f32.vlgmr.msra.gmra.mrb[2].mxu1 %v1172_v45 }
  0xb3   : > { %2462 = vmatpush3.bf16.msra.mxu0 %v2425_v39  ;;  %2480 = vmatpush3.bf16.msra.mxu1 %v2443_v40 }
  0xb4   : > { %2360 = vmatprep.mubr.msk.f32.mxu0 %vm2641_vm0, %v2642_v12  ;;  %2463 = vmatprep.subr.bf16.mxu0 %v2640_v2 }
  0xb5   : > { %2402 = vmatprep.mubr.msk.f32.mxu1 %vm2641_vm0, %v2642_v12  ;;  %2481 = vmatprep.subr.bf16.mxu1 %v2640_v2 }
  0xba   : > { %2361 = vmatmul.mubr.f32.vlgmr.msra.gmra.mrb[2].mxu0 %v1170_v43  ;;  %2403 = vmatmul.mubr.f32.vlgmr.msra.gmra.mrb[2].mxu1 %v1170_v43 }
  0xbb   : > { %2465 = vmatpush3.bf16.msra.mxu0 %v2736_v9  ;;  %2483 = vmatpush3.bf16.msra.mxu1 %v2746_v13 }
  0xbc   : > { %2367 = vmatprep.mubr.msk.f32.mxu0 %vm2641_vm0, %v2642_v12  ;;  %2409 = vmatprep.mubr.msk.f32.mxu1 %vm2641_vm0, %v2642_v12 }
  0xc2   : > { %2368 = vmatmul.mubr.f32.vlgmr.msra.gmra.mrb[2].mxu0 %v1170_v43  ;;  %2410 = vmatmul.mubr.f32.vlgmr.msra.gmra.mrb[2].mxu1 %v1170_v43 }
 0x122   : > { %v625_v48 = vpop.f32.mrb[0].mxu0  ;;  %v1089_v49 = vpop.f32.mrb[0].mxu1 }
 0x123   : > { %630 = vst.msk [vmem:[%s154_s27] sm:$0xff] %vm629_vm2, %v625_v48  ;;  %2162 = vst.msk [vmem:[%s154_s27 + $0x8] sm:$0xff] %vm629_vm2, %v1089_v49  ;;  %v2285_v50 = vpop.f32.mrb[1].mxu0  ;;  %v2327_v51 = vpop.f32.mrb[1].mxu1 }
 0x12a   : > { %v2071_v56 = vld [vmem:[%s154_s27] sm:$0xff] (%p2705_p5)  ;;  %v2073_v57 = vld [vmem:[%s154_s27 + $0x8] sm:$0xff] (%p2705_p5) }
 0x12b   : > { %2072 = vst [vmem:[%s2037_s4] sm:$0xff] (%p2705_p5), %v2071_v56  ;;  %2074 = vst [vmem:[%s2037_s4 + $0x20] sm:$0xff] (%p2705_p5), %v2073_v57 }
 0x190   : > { %2033 = sbr.rel (!%p2705_p5) target bundleno = 415 (0x19f), region = 32 }
 0x195   : > { %v1558_v52 = vpop.f32.mrb[2].mxu0  ;;  %v2021_v53 = vpop.f32.mrb[2].mxu1 }
 0x196   : > { %2163 = vst.msk [vmem:[%s154_s27 + $0x10] sm:$0xff] %vm629_vm2, %v1558_v52  ;;  %2166 = vst.msk [vmem:[%s154_s27 + $0x18] sm:$0xff] %vm629_vm2, %v2021_v53  ;;  %v2369_v54 = vpop.f32.mrb[3].mxu0  ;;  %v2411_v55 = vpop.f32.mrb[3].mxu1 }
 0x19d   : > { %v2075_v58 = vld [vmem:[%s154_s27 + $0x10] sm:$0xff]  ;;  %v2077_v59 = vld [vmem:[%s154_s27 + $0x18] sm:$0xff] }
 0x19e   : > { %2076 = vst [vmem:[%s2037_s4 + $0x40] sm:$0xff] %v2075_v58  ;;  %2078 = vst [vmem:[%s2037_s4 + $0x60] sm:$0xff] %v2077_v59 }
 0x19f PF: > { %s12_s15 = sadd.s32 1, %s2638_s15   ;;  %s2878_s9 = smov %s2618_s10 }
 0x1a0   : > { %p9_p11 = scmp.ge.s32.totalorder %s12_s15, 10   ;;  %s2879_s10 = smov %s2716_s24 }
 0x1a1   : > { %s2880_s11 = smov %s2630_s13  ;;  %s2881_s12 = smov %s2634_s14 }
 0x1a2   : > { %s2882_s13 = smov %s2885_s16  ;;  %s2883_s14 = smov %s2889_s17 }
 0x1a3   :  { %11 = sbr.rel (!%p9_p11) target bundleno = 4 (0x4), region = 100 }

</bundles_post_ra>
